<compile_context>
chip_gen: v5e
topology: v5e:2x2
jax: 0.10.0
libtpu: 0.0.40
codegen_flags: <defaults>
</compile_context>

<pallas_src>
import jax
import jax.numpy as jnp
import numpy as np
from jax.experimental import pallas as pl
from jax.experimental.pallas import tpu as pltpu


def _drop_path_kernel(scale_ref, x_ref, o_ref):
    """scale_ref: (TILE_B, 1) f32.  x_ref / o_ref: (TILE_B, TILE_F) tiles."""
    scale = scale_ref[...]  # f32 per-row scale (0 or 1/keep_prob), lane-broadcast
    o_ref[...] = (x_ref[...].astype(jnp.float32) * scale).astype(o_ref.dtype)


def _pick_tile(dim: int, align: int, cap: int) -> int:
    """Largest power-of-two multiple of `align` dividing `dim`, capped at `cap`.

    Falls back to the full dim (always a legal Pallas block shape) when `dim`
    is not a multiple of `align`.
    """
    if dim % align != 0:
        return dim
    tile = align
    while tile * 2 <= min(dim, cap) and dim % (tile * 2) == 0:
        tile *= 2
    return tile


def drop_path_pallas(x, drop_prob: float = 0.0, training: bool = False, seed: int = 0):
    """Pallas implementation of drop_path (per-sample stochastic depth)."""
    if drop_prob == 0.0 or not training:
        return x
    keep_prob = 1.0 - drop_prob

    B = x.shape[0]
    F = int(np.prod(x.shape[1:])) if x.ndim > 1 else 1
    x2 = x.reshape(B, F)

    # Per-sample scale in f32: floor(keep_prob + U[0,1)) is 1 with prob keep_prob.
    key = jax.random.PRNGKey(seed)
    u = jax.random.uniform(key, (B, 1), dtype=jnp.float32)
    scales = jnp.floor(jnp.float32(keep_prob) + u) / jnp.float32(keep_prob)

    itemsize = jnp.dtype(x.dtype).itemsize
    sublane = max(8, 32 // itemsize)            # 8 for f32, 16 for bf16, 32 for int8
    tile_b = _pick_tile(B, sublane, 64)
    tile_f = _pick_tile(F, 128, 2048)           # <= 64*2048*4B = 512 KiB per buffer

    grid = (B // tile_b, F // tile_f)
    bytes_accessed = 2 * B * F * itemsize + B * 4   # read x + write out + scales

    out = pl.pallas_call(
        _drop_path_kernel,
        out_shape=jax.ShapeDtypeStruct((B, F), x.dtype),
        grid=grid,
        in_specs=[
            pl.BlockSpec((tile_b, 1), lambda i, j: (i, 0)),        # per-row scales
            pl.BlockSpec((tile_b, tile_f), lambda i, j: (i, j)),   # x tile
        ],
        out_specs=pl.BlockSpec((tile_b, tile_f), lambda i, j: (i, j)),
        compiler_params=pltpu.CompilerParams(
            # No carried state between grid steps -> fully parallel (megacore-safe).
            dimension_semantics=("parallel", "parallel"),
            # Headroom above the 16/32 MiB scoped defaults, still < v7x's 64 MiB.
            vmem_limit_bytes=48 * 1024 * 1024,
        ),
        cost_estimate=pl.CostEstimate(
            flops=B * F, transcendentals=0, bytes_accessed=bytes_accessed),
    )(scales, x2)
    return out.reshape(x.shape)


class DropPath:
    """Mirror of the PyTorch DropPath module (forward only)."""

    def __init__(self, drop_prob=None):
        self.drop_prob = drop_prob if drop_prob is not None else 0.0
        self.training = True  # nn.Module default mode

    def __call__(self, x, seed: int = 0):
        # TODO(synk): callers must vary `seed` per layer / per training step to get
        # independent masks across calls (stateless JAX RNG, unlike torch.rand).
        return drop_path_pallas(x, self.drop_prob, self.training, seed=seed)


if __name__ == "__main__":
    key = jax.random.PRNGKey(0)
    x = jax.random.normal(key, (2, 4, 16, 16), dtype=jnp.float32)  # NCHW

    module = DropPath(drop_prob=0.25)
    module.training = True

    y = jax.block_until_ready(module(x, seed=0))

    # Semantics check: each sample is either fully kept (scaled by 1/keep_prob) or all-zero.
    keep_prob = 1.0 - 0.25
    x_np = np.asarray(x)
    y_np = np.asarray(y)
    for b in range(x_np.shape[0]):
        kept = np.allclose(y_np[b], x_np[b] / keep_prob, rtol=1e-6, atol=1e-6)
        dropped = np.allclose(y_np[b], 0.0)
        assert kept or dropped, "each sample must be fully kept (scaled) or fully dropped"

    # eval mode / drop_prob == 0 -> identity
    module.training = False
    y_eval = jax.block_until_ready(module(x))
    assert np.array_equal(np.asarray(y_eval), x_np)

    print("KERNEL_OK")
</pallas_src>

<mosaic_0001>
module attributes {stable_mosaic.version = 11 : i64} {
  func.func @_drop_path_kernel(%arg0: i32, %arg1: i32, %arg2: memref<2x1xf32, #tpu.memory_space<vmem>>, %arg3: memref<2x1024xf32, #tpu.memory_space<vmem>>, %arg4: memref<2x1024xf32, #tpu.memory_space<vmem>>) attributes {dimension_semantics = [#tpu.dimension_semantics<parallel>, #tpu.dimension_semantics<parallel>], iteration_bounds = array<i64: 1, 1>, scalar_prefetch = 0 : i64, scratch_operands = 0 : i64, tpu.core_type = #tpu.core_type<tc>, window_params = [{transform_indices = @transform_0, window_bounds = array<i64: 2, 1>}, {transform_indices = @transform_1, window_bounds = array<i64: 2, 1024>}, {transform_indices = @transform_2, window_bounds = array<i64: 2, 1024>}]} {
    %c0 = arith.constant 0 : index
    %c0_0 = arith.constant 0 : index
    %0 = vector.load %arg2[%c0, %c0_0] : memref<2x1xf32, #tpu.memory_space<vmem>>, vector<2x1xf32>
    %c0_1 = arith.constant 0 : index
    %c0_2 = arith.constant 0 : index
    %1 = vector.load %arg3[%c0_1, %c0_2] : memref<2x1024xf32, #tpu.memory_space<vmem>>, vector<2x1024xf32>
    %2 = vector.broadcast %0 : vector<2x1xf32> to vector<2x1024xf32>
    %3 = arith.mulf %1, %2 : vector<2x1024xf32>
    %c0_3 = arith.constant 0 : index
    %c0_4 = arith.constant 0 : index
    %4 = vector.load %arg4[%c0_3, %c0_4] : memref<2x1024xf32, #tpu.memory_space<vmem>>, vector<2x1024xf32>
    tpu.vector_store %arg4[%c0_3, %c0_4], %3 {strides = array<i32>} : memref<2x1024xf32, #tpu.memory_space<vmem>>, vector<2x1024xf32>,
    return
  }
  func.func @transform_0(%arg0: i32, %arg1: i32) -> (i32, i32) {
    %c0_i32 = arith.constant 0 : i32
    %c0_i32_0 = arith.constant 0 : i32
    return %arg0, %c0_i32 : i32, i32
  }
  func.func @transform_1(%arg0: i32, %arg1: i32) -> (i32, i32) {
    %c0_i32 = arith.constant 0 : i32
    return %arg0, %arg1 : i32, i32
  }
  func.func @transform_2(%arg0: i32, %arg1: i32) -> (i32, i32) {
    %c0_i32 = arith.constant 0 : i32
    return %arg0, %arg1 : i32, i32
  }
}

</mosaic_0001>

<bundles_post_ra>
// kernel: tpu_custom_call.1
= control target key start
LH: loop header
LB: loop body
LE: loop exit
PB: predicated region body
PF: predicated region fallthrough
CT: control target
= control target key end

     0   :  { %7 = vsyncpa [#allocation3], 0  ;;  %s144_s0 = inlined_call_operand.vmem [shape: f32[2,1], index: 0, kind: input, shape index: {}]   ;;  %s145_s1 = inlined_call_operand.hbm [shape: f32[2,1024], index: 1, kind: input, shape index: {}]   ;;  %s146_s2 = inlined_call_operand.hbm [shape: f32[2,1024], index: 2, kind: output, shape index: {}]  }
   0x1   :  { %8 = vsyncpa [#allocation4], 0  ;;  %s16_s11 = sshll.u32 %s145_s1, 4  ;;  %s116_s12 = smov [#allocation2]   ;;  %s17_s11 = int_to_ptr.hbm [resolvable:$true] %s16_s11 }
   0x2   :  { %s18_s13 = sshll.u32 %s116_s12, 4  ;;  %s19_s13 = int_to_ptr.vmem [resolvable:$true] %s18_s13 }
   0x3   :  { %21 = dma.hbm_to_vmem [thread:$0]  %s17_s11, 256, %s19_s13, [#allocation3]  }
   0x4   :  { %112 = dma.done.wait [#allocation3], 256  }
   0x5   :  { %113 = vsyncadd [#allocation3], 4294967040  ;;  %v117_v0 = vmov 0   ;;  %v26_v1 = vld [vmem:[%s144_s0] sm:$0x3]  ;;  %v28_v6 = vld [vmem:[#allocation2 + $0x8] sm:$0xff] }
   0x6   :  { %63 = vset.pattern.permute.xlu0 %v117_v0  ;;  %v118_v2 = vmov 269488144   ;;  %v27_v5 = vld [vmem:[#allocation2] sm:$0xff]  ;;  %s119_s1 = smov [#allocation5]   ;;  %s49_s19 = sshll.u32 %s146_s2, 4  ;;  %s50_s19 = int_to_ptr.hbm [resolvable:$true] %s49_s19 }
   0x7   :  { %31 = vperm.xlu0 %63, %v26_v1   ;;  %v34_v3 = vunpack.c.l.s4 %v118_v2  ;;  %s47_s16 = sshll.u32 %s119_s1, 4  ;;  %s48_s16 = int_to_ptr.vmem [resolvable:$true] %s47_s16 }
   0x9   :  { %v35_v4 = vunpack.c.0.s8 %v34_v3 }
  0x79   :  { %v32_v7 = vpop.permute.xlu0 %31 }
  0x7a   :  { %v36_v8 = vperm.slane %v32_v7, %v35_v4 }
  0x7c   :  { %v38_v9 = vmul.f32 %v36_v8, %v27_v5  ;;  %v39_v10 = vmul.f32 %v36_v8, %v28_v6 }
  0x7e   :  { %40 = vst [vmem:[#allocation5] sm:$0xff] %v38_v9 }
  0x7f   :  { %41 = vst [vmem:[#allocation5 + $0x8] sm:$0xff] %v39_v10 }
  0x80   :  { %52 = dma.vmem_to_hbm [thread:$0]  %s48_s16, 256, %s50_s19, [#allocation4]  }
  0x81   :  { %114 = dma.done.wait [#allocation4], 256  }
  0x82   :  { %115 = vsyncadd [#allocation4], 4294967040 }
  0x83   :  { %57 = vsyncpa [#allocation3], 1 }
  0x84   :  { %58 = vsyncpa [#allocation4], 1 }

</bundles_post_ra>
